<compile_context>
chip_gen: v5e
topology: v5e:2x2
jax: 0.10.0
libtpu: 0.0.40
codegen_flags: <defaults>
</compile_context>

<pallas_src>
import functools

import jax
import jax.numpy as jnp
from jax import lax
from jax.experimental import pallas as pl
from jax.experimental.pallas import tpu as pltpu


def _moco_loss_kernel(temp_ref, q_ref, k_ref, queue_ref, nll_ref,
                      qs_ref, m_ref, s_ref, pos0_ref, *, k_valid):
    """One (row-block, queue-tile) grid step of the online-logsumexp MoCo loss."""
    kb = pl.program_id(1)

    # --- first queue tile: scale q once, compute the positive block ---------
    @pl.when(kb == 0)
    def _():
        inv_t = jnp.float32(1.0) / temp_ref[0].astype(jnp.float32)
        # Fold 1/T into q once per row block (kept in the matmul input dtype).
        qs = (q_ref[...].astype(jnp.float32) * inv_t).astype(qs_ref.dtype)
        qs_ref[...] = qs
        # pos = (q / T) @ k^T without an explicit transpose: contract dim 1 vs 1.
        pos = lax.dot_general(
            qs, k_ref[...],
            dimension_numbers=(((1,), (1,)), ((), ())),
            preferred_element_type=jnp.float32,
        )                                                     # [TN, N]
        m0 = jnp.max(pos, axis=1, keepdims=True)
        m_ref[...] = m0
        s_ref[...] = jnp.sum(jnp.exp(pos - m0), axis=1, keepdims=True)
        # Column 0 of the concatenated logits == pos[:, 0] (module semantics).
        pos0_ref[...] = pos[:, 0:1]

    # --- negative tile: (q / T) @ queue_tile --------------------------------
    neg = lax.dot_general(
        qs_ref[...], queue_ref[...],
        dimension_numbers=(((1,), (0,)), ((), ())),
        preferred_element_type=jnp.float32,
    )                                                         # [TN, TK]

    if k_valid is not None:
        # Mask out padded queue columns (K was rounded up to a tile multiple).
        tk = neg.shape[1]
        col = kb * tk + lax.broadcasted_iota(jnp.int32, neg.shape, 1)
        neg = jnp.where(col < k_valid, neg, jnp.float32(-1e30))

    # --- online logsumexp update --------------------------------------------
    m_prev = m_ref[...]
    m_new = jnp.maximum(m_prev, jnp.max(neg, axis=1, keepdims=True))
    s_ref[...] = (s_ref[...] * jnp.exp(m_prev - m_new)
                  + jnp.sum(jnp.exp(neg - m_new), axis=1, keepdims=True))
    m_ref[...] = m_new

    # --- finalize: per-row negative log-prob of logit column 0 --------------
    @pl.when(kb == pl.num_programs(1) - 1)
    def _():
        nll_ref[...] = m_ref[...] + jnp.log(s_ref[...]) - pos0_ref[...]


def _round_up(x, m):
    return (x + m - 1) // m * m


def _pick_block_n(n):
    for cand in (256, 128, 64, 32, 16, 8):
        if n % cand == 0:
            return cand
    return n  # tiny / odd batch: single row block


def moco_loss(q, k, queue, *, temperature=0.07, block_k=2048, block_n=None):
    """MoCoLoss forward: -mean(log_softmax([q@k.T, q@queue] / T, axis=1)[:, 0])."""
    n, d = q.shape
    d2, kq = queue.shape
    assert k.shape == (n, d) and d2 == d

    if block_n is None:
        block_n = _pick_block_n(n)
    assert n % block_n == 0

    # Queue tile: lane-dense multiple of 128, capped so VMEM use is bounded
    # regardless of K (fits v7x's smaller VMEM with double buffering).
    tk = min(block_k, _round_up(kq, 128))
    kq_pad = _round_up(kq, tk)
    if kq_pad != kq:
        queue = jnp.pad(queue, ((0, 0), (0, kq_pad - kq)))
        k_valid = kq          # mask padded columns inside the kernel
    else:
        k_valid = None        # no padding -> mask statically traced away

    n_blocks = n // block_n
    k_blocks = kq_pad // tk

    temp = jnp.full((1,), temperature, dtype=jnp.float32)

    itemsize = jnp.dtype(q.dtype).itemsize
    cost = pl.CostEstimate(
        flops=2 * n * d * (n + kq),
        transcendentals=n * (n + kq),
        bytes_accessed=(2 * n * d + d * kq) * itemsize + n * 4,
    )

    kernel = functools.partial(_moco_loss_kernel, k_valid=k_valid)

    nll = pl.pallas_call(
        kernel,
        out_shape=jax.ShapeDtypeStruct((n, 1), jnp.float32),
        grid=(n_blocks, k_blocks),
        in_specs=[
            pl.BlockSpec(memory_space=pltpu.MemorySpace.SMEM),    # temperature (scalar)
            pl.BlockSpec((block_n, d), lambda i, j: (i, 0)),      # q row block (resident over K)
            pl.BlockSpec((n, d), lambda i, j: (0, 0)),            # full k (fetched once)
            pl.BlockSpec((d, tk), lambda i, j: (0, j)),           # queue tile (pipelined)
        ],
        out_specs=pl.BlockSpec((block_n, 1), lambda i, j: (i, 0)),
        scratch_shapes=[
            pltpu.VMEM((block_n, d), q.dtype),       # q pre-scaled by 1/T
            pltpu.VMEM((block_n, 1), jnp.float32),   # running max
            pltpu.VMEM((block_n, 1), jnp.float32),   # running sum of exp
            pltpu.VMEM((block_n, 1), jnp.float32),   # positive logit (column 0)
        ],
        compiler_params=pltpu.CompilerParams(
            dimension_semantics=("parallel", "arbitrary")),
        cost_estimate=cost,
    )(temp, q, k, queue)

    # Tiny final reduction stays in the wrapper.
    return jnp.mean(nll[:, 0])


def _reference_moco_loss(q, k, queue, temperature=0.07):
    pos_sim = (q @ k.T) / temperature
    neg_sim = (q @ queue) / temperature
    logits = jnp.concatenate([pos_sim, neg_sim], axis=1)
    logp = jax.nn.log_softmax(logits, axis=1)
    return -jnp.mean(logp[:, 0])


if __name__ == "__main__":
    # Small shapes consistent with MoCo: N queries, D-dim embeddings, K negatives.
    # K=300 is deliberately NOT a multiple of the 128-lane tile (exercises the
    # in-kernel padding mask); block_k=128 forces several queue tiles so the
    # online logsumexp accumulation path is exercised too.
    N, D, K = 8, 32, 300
    key = jax.random.PRNGKey(0)
    kq_, kk_, kqu_ = jax.random.split(key, 3)

    q = jax.random.normal(kq_, (N, D), dtype=jnp.float32)
    k = jax.random.normal(kk_, (N, D), dtype=jnp.float32)
    queue = jax.random.normal(kqu_, (D, K), dtype=jnp.float32)
    q = q / jnp.linalg.norm(q, axis=1, keepdims=True)
    k = k / jnp.linalg.norm(k, axis=1, keepdims=True)
    queue = queue / jnp.linalg.norm(queue, axis=0, keepdims=True)

    loss = jax.block_until_ready(moco_loss(q, k, queue, block_k=128))
    ref = jax.block_until_ready(_reference_moco_loss(q, k, queue))

    assert jnp.allclose(loss, ref, rtol=1e-4, atol=1e-4), (loss, ref)
    print("KERNEL_OK")
</pallas_src>

<mosaic_0001>
module attributes {stable_mosaic.version = 11 : i64} {
  func.func @_moco_loss_kernel(%arg0: i32, %arg1: i32, %arg2: memref<1xf32, #tpu.memory_space<smem>>, %arg3: memref<8x32xf32, #tpu.memory_space<vmem>>, %arg4: memref<8x32xf32, #tpu.memory_space<vmem>>, %arg5: memref<32x128xf32, #tpu.memory_space<vmem>>, %arg6: memref<8x1xf32, #tpu.memory_space<vmem>>, %arg7: memref<8x32xf32, #tpu.memory_space<vmem>>, %arg8: memref<8x1xf32, #tpu.memory_space<vmem>>, %arg9: memref<8x1xf32, #tpu.memory_space<vmem>>, %arg10: memref<8x1xf32, #tpu.memory_space<vmem>>) attributes {dimension_semantics = [#tpu.dimension_semantics<parallel>, #tpu.dimension_semantics<arbitrary>], iteration_bounds = array<i64: 1, 3>, scalar_prefetch = 0 : i64, scratch_operands = 4 : i64, tpu.core_type = #tpu.core_type<tc>, window_params = [{transform_indices = @transform_0, window_bounds = array<i64: 1>}, {transform_indices = @transform_1, window_bounds = array<i64: 8, 32>}, {pipeline_mode = #tpu.pipeline_mode<synchronous>, transform_indices = @transform_2, window_bounds = array<i64: 8, 32>}, {transform_indices = @transform_3, window_bounds = array<i64: 32, 128>}, {transform_indices = @transform_4, window_bounds = array<i64: 8, 1>}]} {
    %c0_i32 = arith.constant 0 : i32
    %0 = arith.cmpi eq, %arg1, %c0_i32 : i32
    %1 = arith.extui %0 : i1 to i32
    %c0_i32_0 = arith.constant 0 : i32
    %2 = arith.cmpi ne, %1, %c0_i32_0 : i32
    scf.if %2 {
      %c0_16 = arith.constant 0 : index
      %33 = memref.load %arg2[%c0_16] : memref<1xf32, #tpu.memory_space<smem>>
      %cst_17 = arith.constant 1.000000e+00 : f32
      %34 = arith.divf %cst_17, %33 : f32
      %c0_18 = arith.constant 0 : index
      %c0_19 = arith.constant 0 : index
      %35 = vector.load %arg3[%c0_18, %c0_19] : memref<8x32xf32, #tpu.memory_space<vmem>>, vector<8x32xf32>
      %36 = vector.broadcast %34 : f32 to vector<8x32xf32>
      %37 = arith.mulf %35, %36 : vector<8x32xf32>
      %c0_20 = arith.constant 0 : index
      %c0_21 = arith.constant 0 : index
      %38 = vector.load %arg7[%c0_20, %c0_21] : memref<8x32xf32, #tpu.memory_space<vmem>>, vector<8x32xf32>
      tpu.vector_store %arg7[%c0_20, %c0_21], %37 {strides = array<i32>} : memref<8x32xf32, #tpu.memory_space<vmem>>, vector<8x32xf32>,
      %c0_22 = arith.constant 0 : index
      %c0_23 = arith.constant 0 : index
      %39 = vector.load %arg4[%c0_22, %c0_23] : memref<8x32xf32, #tpu.memory_space<vmem>>, vector<8x32xf32>
      %cst_24 = arith.constant dense<0.000000e+00> : vector<8x8xf32>
      %40 = tpu.matmul %37, %39, %cst_24 {dimension_numbers = #tpu.dot_dimension_numbers<[1], [1], [0], [0], [0, 0, 1, 0], [], []>} : vector<8x32xf32>, vector<8x32xf32>, vector<8x8xf32> -> vector<8x8xf32>
      %cst_25 = arith.constant dense<0xFF800000> : vector<8xf32>
      %41 = vector.multi_reduction <maximumf>, %40, %cst_25 [1] : vector<8x8xf32> to vector<8xf32>
      %42 = vector.shape_cast %41 : vector<8xf32> to vector<8x1xf32>
      %c0_26 = arith.constant 0 : index
      %c0_27 = arith.constant 0 : index
      %43 = vector.load %arg8[%c0_26, %c0_27] : memref<8x1xf32, #tpu.memory_space<vmem>>, vector<8x1xf32>
      tpu.vector_store %arg8[%c0_26, %c0_27], %42 {strides = array<i32>} : memref<8x1xf32, #tpu.memory_space<vmem>>, vector<8x1xf32>,
      %44 = vector.broadcast %42 : vector<8x1xf32> to vector<8x8xf32>
      %45 = arith.subf %40, %44 : vector<8x8xf32>
      %46 = math.exp %45 : vector<8x8xf32>
      %cst_28 = arith.constant dense<0.000000e+00> : vector<8xf32>
      %47 = vector.multi_reduction <add>, %46, %cst_28 [1] : vector<8x8xf32> to vector<8xf32>
      %48 = vector.shape_cast %47 : vector<8xf32> to vector<8x1xf32>
      %c0_29 = arith.constant 0 : index
      %c0_30 = arith.constant 0 : index
      %49 = vector.load %arg9[%c0_29, %c0_30] : memref<8x1xf32, #tpu.memory_space<vmem>>, vector<8x1xf32>
      tpu.vector_store %arg9[%c0_29, %c0_30], %48 {strides = array<i32>} : memref<8x1xf32, #tpu.memory_space<vmem>>, vector<8x1xf32>,
      %50 = vector.extract_strided_slice %40 {offsets = [0, 0], sizes = [8, 1], strides = [1, 1]} : vector<8x8xf32> to vector<8x1xf32>
      %c0_31 = arith.constant 0 : index
      %c0_32 = arith.constant 0 : index
      %51 = vector.load %arg10[%c0_31, %c0_32] : memref<8x1xf32, #tpu.memory_space<vmem>>, vector<8x1xf32>
      tpu.vector_store %arg10[%c0_31, %c0_32], %50 {strides = array<i32>} : memref<8x1xf32, #tpu.memory_space<vmem>>, vector<8x1xf32>,
    } else {
    }
    %c0 = arith.constant 0 : index
    %c0_1 = arith.constant 0 : index
    %3 = vector.load %arg7[%c0, %c0_1] : memref<8x32xf32, #tpu.memory_space<vmem>>, vector<8x32xf32>
    %c0_2 = arith.constant 0 : index
    %c0_3 = arith.constant 0 : index
    %4 = vector.load %arg5[%c0_2, %c0_3] : memref<32x128xf32, #tpu.memory_space<vmem>>, vector<32x128xf32>
    %cst = arith.constant dense<0.000000e+00> : vector<8x128xf32>
    %5 = tpu.matmul %3, %4, %cst {dimension_numbers = #tpu.dot_dimension_numbers<[1], [0], [0], [1], [0, 0, 1, 1], [], []>} : vector<8x32xf32>, vector<32x128xf32>, vector<8x128xf32> -> vector<8x128xf32>
    %c128_i32 = arith.constant 128 : i32
    %6 = arith.muli %arg1, %c128_i32 : i32
    %7 = tpu.iota {dimensions = array<i32: 1>} : vector<8x128xi32>
    %8 = vector.broadcast %6 : i32 to vector<8x128xi32>
    %9 = arith.addi %8, %7 : vector<8x128xi32>
    %c300_i32 = arith.constant 300 : i32
    %10 = vector.broadcast %c300_i32 : i32 to vector<8x128xi32>
    %11 = arith.cmpi slt, %9, %10 : vector<8x128xi32>
    %cst_4 = arith.constant -1.000000e+30 : f32
    %12 = vector.broadcast %cst_4 : f32 to vector<8x128xf32>
    %13 = arith.select %11, %5, %12 : vector<8x128xi1>, vector<8x128xf32>
    %c0_5 = arith.constant 0 : index
    %c0_6 = arith.constant 0 : index
    %14 = vector.load %arg8[%c0_5, %c0_6] : memref<8x1xf32, #tpu.memory_space<vmem>>, vector<8x1xf32>
    %cst_7 = arith.constant dense<0xFF800000> : vector<8xf32>
    %15 = vector.multi_reduction <maximumf>, %13, %cst_7 [1] : vector<8x128xf32> to vector<8xf32>
    %16 = vector.shape_cast %15 : vector<8xf32> to vector<8x1xf32>
    %17 = arith.maximumf %14, %16 : vector<8x1xf32>
    %c0_8 = arith.constant 0 : index
    %c0_9 = arith.constant 0 : index
    %18 = vector.load %arg9[%c0_8, %c0_9] : memref<8x1xf32, #tpu.memory_space<vmem>>, vector<8x1xf32>
    %19 = arith.subf %14, %17 : vector<8x1xf32>
    %20 = math.exp %19 : vector<8x1xf32>
    %21 = arith.mulf %18, %20 : vector<8x1xf32>
    %22 = vector.broadcast %17 : vector<8x1xf32> to vector<8x128xf32>
    %23 = arith.subf %13, %22 : vector<8x128xf32>
    %24 = math.exp %23 : vector<8x128xf32>
    %cst_10 = arith.constant dense<0.000000e+00> : vector<8xf32>
    %25 = vector.multi_reduction <add>, %24, %cst_10 [1] : vector<8x128xf32> to vector<8xf32>
    %26 = vector.shape_cast %25 : vector<8xf32> to vector<8x1xf32>
    %27 = arith.addf %21, %26 : vector<8x1xf32>
    %c0_11 = arith.constant 0 : index
    %c0_12 = arith.constant 0 : index
    %28 = vector.load %arg9[%c0_11, %c0_12] : memref<8x1xf32, #tpu.memory_space<vmem>>, vector<8x1xf32>
    tpu.vector_store %arg9[%c0_11, %c0_12], %27 {strides = array<i32>} : memref<8x1xf32, #tpu.memory_space<vmem>>, vector<8x1xf32>,
    %c0_13 = arith.constant 0 : index
    %c0_14 = arith.constant 0 : index
    %29 = vector.load %arg8[%c0_13, %c0_14] : memref<8x1xf32, #tpu.memory_space<vmem>>, vector<8x1xf32>
    tpu.vector_store %arg8[%c0_13, %c0_14], %17 {strides = array<i32>} : memref<8x1xf32, #tpu.memory_space<vmem>>, vector<8x1xf32>,
    %c2_i32 = arith.constant 2 : i32
    %30 = arith.cmpi eq, %arg1, %c2_i32 : i32
    %31 = arith.extui %30 : i1 to i32
    %c0_i32_15 = arith.constant 0 : i32
    %32 = arith.cmpi ne, %31, %c0_i32_15 : i32
    scf.if %32 {
      %c0_16 = arith.constant 0 : index
      %c0_17 = arith.constant 0 : index
      %33 = vector.load %arg8[%c0_16, %c0_17] : memref<8x1xf32, #tpu.memory_space<vmem>>, vector<8x1xf32>
      %c0_18 = arith.constant 0 : index
      %c0_19 = arith.constant 0 : index
      %34 = vector.load %arg9[%c0_18, %c0_19] : memref<8x1xf32, #tpu.memory_space<vmem>>, vector<8x1xf32>
      %35 = math.log %34 : vector<8x1xf32>
      %36 = arith.addf %33, %35 : vector<8x1xf32>
      %c0_20 = arith.constant 0 : index
      %c0_21 = arith.constant 0 : index
      %37 = vector.load %arg10[%c0_20, %c0_21] : memref<8x1xf32, #tpu.memory_space<vmem>>, vector<8x1xf32>
      %38 = arith.subf %36, %37 : vector<8x1xf32>
      %c0_22 = arith.constant 0 : index
      %c0_23 = arith.constant 0 : index
      %39 = vector.load %arg6[%c0_22, %c0_23] : memref<8x1xf32, #tpu.memory_space<vmem>>, vector<8x1xf32>
      tpu.vector_store %arg6[%c0_22, %c0_23], %38 {strides = array<i32>} : memref<8x1xf32, #tpu.memory_space<vmem>>, vector<8x1xf32>,
    } else {
    }
    return
  }
  func.func @transform_0(%arg0: i32, %arg1: i32) -> i32 {
    %c0_i32 = arith.constant 0 : i32
    %c0_i32_0 = arith.constant 0 : i32
    return %c0_i32 : i32
  }
  func.func @transform_1(%arg0: i32, %arg1: i32) -> (i32, i32) {
    %c0_i32 = arith.constant 0 : i32
    %c0_i32_0 = arith.constant 0 : i32
    return %arg0, %c0_i32 : i32, i32
  }
  func.func @transform_2(%arg0: i32, %arg1: i32) -> (i32, i32) {
    %c0_i32 = arith.constant 0 : i32
    %c0_i32_0 = arith.constant 0 : i32
    %c0_i32_1 = arith.constant 0 : i32
    return %c0_i32, %c0_i32_0 : i32, i32
  }
  func.func @transform_3(%arg0: i32, %arg1: i32) -> (i32, i32) {
    %c0_i32 = arith.constant 0 : i32
    %c0_i32_0 = arith.constant 0 : i32
    return %c0_i32, %arg1 : i32, i32
  }
  func.func @transform_4(%arg0: i32, %arg1: i32) -> (i32, i32) {
    %c0_i32 = arith.constant 0 : i32
    %c0_i32_0 = arith.constant 0 : i32
    return %arg0, %c0_i32 : i32, i32
  }
}

</mosaic_0001>

<bundles_post_ra>
// kernel: tpu_custom_call.1
= control target key start
LH: loop header
LB: loop body
LE: loop exit
PB: predicated region body
PF: predicated region fallthrough
CT: control target
= control target key end

     0   :  { %s931_s0 = inlined_call_operand.<no memory space> [shape: f32[1], index: 0, kind: input, shape index: {}]   ;;  %s932_s1 = inlined_call_operand.hbm [shape: f32[8,32], index: 1, kind: input, shape index: {}]   ;;  %s933_s2 = inlined_call_operand.hbm [shape: f32[8,32], index: 2, kind: input, shape index: {}]   ;;  %s934_s3 = inlined_call_operand.hbm [shape: f32[32,384], index: 3, kind: input, shape index: {}]   ;;  %s935_s4 = inlined_call_operand.vmem [shape: f32[8,1], index: 4, kind: output, shape index: {}]  }
   0x1   :  { %9 = sst [smem:[#allocation6]] %s931_s0 }
   0x2   :  { %10 = vsyncpa [#allocation8], 0 }
   0x3   :  { %11 = vsyncpa [#allocation10], 0  ;;  %s790_s17 = smov 0   ;;  %s792_s18 = smov 0  }
   0x4   :  { %s794_s19 = smov 0   ;;  %s796_s20 = smov 0  }
   0x5   :  { %s798_s21 = smov 0   ;;  %s800_s22 = smov 0  }
   0x6 LB: > { %s493_s0 = sadd.s32 4294967295, %s754_s22   ;;  %s104_s23 = sadd.s32 1, %s742_s19  ;;  %s754_s22 = sphi %s800_s22, %s17_s22   ;;  %s750_s21 = sphi %s798_s21, %s945_s21   ;;  %s746_s20 = sphi %s796_s20, %s944_s20   ;;  %s742_s19 = sphi %s794_s19, %s943_s19   ;;  %s738_s18 = sphi %s792_s18, %s942_s18   ;;  %s734_s17 = sphi %s790_s17, %s941_s17  }
   0x7   : > { %p111_p0 = scmp.ne.s32.totalorder %s742_s19, %s738_s18  ;;  %p112_p1 = scmp.eq.s32.totalorder %s754_s22, 0 }
   0x8   : > { %p117_p2 = scmp.ne.s32.totalorder %s738_s18, %s734_s17  ;;  %p826_p3 = scmp.eq.s32.totalorder %s493_s0, 0 }
   0x9   : > { %p830_p4 = por %p112_p1, %p111_p0  ;;  %p494_p5 = scmp.ge.s32.totalorder %s754_s22, 1 }
   0xa   : > { %p837_p6 = por %p826_p3, %p117_p2  ;;  %p154_p7 = scmp.lt.s32.totalorder %s754_s22, 4 }
   0xb   : > { %s171_s29 = sshll.u32 %s932_s1, 4  ;;  %s756_s5 = smov [#allocation7]   ;;  %s172_s29 = int_to_ptr.hbm [resolvable:$true] %s171_s29 }
   0xc   : > { %p845_p8 = pnand %p494_p5, %p154_p7  ;;  %s173_s6 = sshll.u32 %s756_s5, 4  ;;  %s174_s6 = int_to_ptr.vmem [resolvable:$true] %s173_s6 }
   0xd   : > { %p538_p10 = scmp.lt.s32.totalorder %s754_s22, 3  ;;  %s183_s9 = sshll.u32 %s933_s2, 4  ;;  %s184_s9 = int_to_ptr.hbm [resolvable:$true] %s183_s9 }
   0xe   : > { %p525_p9 = pneg %p845_p8  ;;  %s757_s11 = smov [#allocation9]  }
   0xf   : > { %p859_p12 = pnand %p538_p10, %p830_p4  ;;  %s185_s12 = sshll.u32 %s757_s11, 4  ;;  %s186_s12 = int_to_ptr.vmem [resolvable:$true] %s185_s12 }
  0x10   : > { %p526_p11 = pnand %p525_p9, %p826_p3  ;;  %s196_s13 = sand.u32 1, %s754_s22  }
  0x11   : > { %s26_s14 = sadd.s32 1, %s750_s21  ;;  %s198_s15 = sand.u32 1, %s742_s19  }
  0x12   : > { %528 = dma.hbm_to_vmem [thread:$0]  (!%p526_p11), %s172_s29, 128, %s174_s6, [#allocation8]  }
  0x13   : > { %531 = dma.hbm_to_vmem [thread:$0]  (!%p526_p11), %s184_s9, 128, %s186_s12, [#allocation10]  }
  0x14   : > { %p27_p13 = scmp.ge.s32.totalorder %s26_s14, 3  ;;  %s498_s16 = sshll.u32 %s198_s15, 5 }
  0x15   : > { %s499_s17 = sshll.u32 %s750_s21, 3  ;;  %s200_s6 = scalar_lea.vmem [#allocation11], %s498_s16 }
  0x16   : > { %s947_s14 = smov (%p27_p13, %s26_s14), 0  ;;  %s204_s28 = scalar_lea.hbm %s934_s3, %s499_s17 }
  0x17   : > { %s101_s29 = ssub.s32 %s750_s21, %s947_s14  ;;  %s205_s5 = sshll.u32 %s204_s28, 4  ;;  %s206_s5 = int_to_ptr.hbm [resolvable:$true] %s205_s5 }
  0x18   : > { %p102_p0 = scmp.eq.s32.totalorder %s101_s29, 0  ;;  %s207_s7 = sshll.u32 %s200_s6, 4  ;;  %s208_s7 = int_to_ptr.vmem [resolvable:$true] %s207_s7 }
  0x19   : > { %s197_s9 = scalar_lea.sflag [#allocation8], %s196_s13  ;;  %s758_s11 = smov 384  }
  0x1a   : > { %s877_s8 = scalar_select %p102_p0, %s742_s19, %s104_s23  }
  0x1b   : > { %s759_s12 = smov 128   ;;  %s760_s15 = smov 8  }
  0x1c   : > { %535 = dma.hbm_to_vmem [thread:$0]  (!%p859_p12), %s206_s5, 512, %s208_s7, %s197_s9, %s758_s11, %s759_s12, %s760_s15  }
  0x1d   : > { %219 = sbr.rel (%p845_p8) target bundleno = 1010 (0x3f2), region = 36 }
  0x22   : > { %721 = dma.done.wait (%p826_p3), [#allocation8], 128  }
  0x23   : > { %723 = vsyncadd (%p826_p3), [#allocation8], 4294967168 }
  0x24   : > { %725 = dma.done.wait (%p826_p3), [#allocation10], 128  }
  0x25   : > { %727 = vsyncadd (%p826_p3), [#allocation10], 4294967168  ;;  %s231_s23 = sand.u32 1, %s493_s0   ;;  %s233_s10 = sand.u32 1, %s738_s18  }
  0x26   : > { %s503_s30 = sshll.u32 %s233_s10, 5  ;;  %s232_s13 = scalar_lea.sflag [#allocation8], %s231_s23 }
  0x27   : > { %s894_s16 = scalar_lea.vmem [#allocation11], %s503_s30 }
  0x28   : > { %729 = dma.done.wait (%p837_p6), %s232_s13, 512  }
  0x29   : > { %731 = vsyncadd (%p837_p6), %s232_s13, 4294966784  ;;  %p504_p1 = scmp.ne.s32.totalorder %s746_s20, 0 }
  0x2a   : > { %s268_s24 = sld [smem:[#allocation6]] (!%p504_p1) }
  0x2b   : > { %267 = sbr.rel (%p504_p1) target bundleno = 491 (0x1eb), region = 52 }
  0x30   : > { %v269_v0 = vstv %s268_s24  ;;  %vm288_vm4 = vcmask 261120   ;;  %v290_v11 = vld [vmem:[#allocation9] sm:$0xff]  ;;  %v285_v12 = vld [vmem:[#allocation7] sm:$0xff]  ;;  %vm321_vm5 = vcmask 7168   ;;  %vm317_vm6 = vcmask 64512  }
  0x31   : > { %595 = vrcp.f32 %v269_v0  ;;  %v281_v3 = vand.u32 2147483648, %v269_v0  ;;  %vm275_vm0 = vweird.f32 %v269_v0  ;;  %v279_v5 = vand.u32 2147483647, %v269_v0  ;;  %505 = vmatpush.xpose.msk.msra.mxu0 %vm288_vm4, %v290_v11 }
  0x33   : > { %v282_v7 = vor.u32 1.1754944e-38, %v281_v3  ;;  %vm280_vm3 = vcmp.eq.f32.partialorder %v279_v5, 8.507059e+37 }
  0x37   : > { %v596_v1 = vpop.eup %595 }
  0x38   : > { %v271_v2 = vmul.f32 %v596_v1, %v269_v0  ;;  %vm276_vm1 = vweird.f32 %v596_v1 }
  0x39   : > { %vm277_vm2 = vmor %vm275_vm0, %vm276_vm1 }
  0x3a   : > { %v272_v4 = vsub.f32 1.0, %v271_v2 }
  0x3c   : > { %v273_v6 = vmul.f32 %v596_v1, %v272_v4 }
  0x3e   : > { %v274_v8 = vadd.f32 %v596_v1, %v273_v6 }
  0x40   : > { %v278_v9 = vsel %vm277_vm2, %v596_v1, %v274_v8 }
  0x41   : > { %v283_v10 = vsel %vm280_vm3, %v282_v7, %v278_v9 }
  0x42   : > { %513 = vpush %v283_v10 }
  0x73   : > { %s514_s0 = spop %513 }
  0x74   : > { %v286_v13 = vstv %s514_s0 }
  0x75   : > { %v287_v14 = vmul.f32 %v286_v13, %v285_v12 }
  0x77   : > { %289 = vst.msk [vmem:[#allocation2] sm:$0xff] %vm288_vm4, %v287_v14  ;;  %506 = vmatmul.msk.f32.vlgmr.msra.gmra.mxu0 %vm288_vm4, %v287_v14 }
  0xf4   : > { %v314_v15 = vpop.f32.mrf.mxu0 }
  0xf5   : > { %330 = vst.msk [vmem:[#allocation5] sm:$0xff] %vm321_vm5, %v314_v15  ;;  %v318_v16 = vsel %vm317_vm6, %v314_v15, -inf }
  0xf6   : > { %319 = vmax.xlane.f32.xlu0 %v318_v16 }
 0x169   : > { %v320_v17 = vpop.xlane.xlu0 %319 }
 0x16a   : > { %322 = vst.msk [vmem:[#allocation3] sm:$0xff] %vm321_vm5, %v320_v17  ;;  %v323_v18 = vsub.f32 %v314_v15, %v320_v17 }
 0x16c   : > { %v324_v19 = vmul.f32 1.442695, %v323_v18 }
 0x16e   : > { %597 = vpow2.f32 %v324_v19 }
 0x174   : > { %v598_v20 = vpop.eup %597 }
 0x175   : > { %v326_v21 = vsel %vm317_vm6, %v598_v20, 0.0 }
 0x176   : > { %327 = vadd.xlane.f32.xlu0 %v326_v21 }
 0x1e9   : > { %v328_v22 = vpop.xlane.xlu0 %327 }
 0x1ea   : > { %329 = vst.msk [vmem:[#allocation4] sm:$0xff] %vm321_vm5, %v328_v22 }
 0x1eb PF: > { %v335_v23 = vld [vmem:[%s894_s16 + $0x18] sm:$0xff]  ;;  %v334_v24 = vld [vmem:[%s894_s16 + $0x10] sm:$0xff]  ;;  %v333_v25 = vld [vmem:[%s894_s16 + $0x8] sm:$0xff]  ;;  %vm336_vm7 = vcmask 261120   ;;  %v361_v28 = vlaneseq  ;;  %s508_s26 = sshll.u32 %s746_s20, 7  ;;  %v761_v34 = vmov 0  }
 0x1ec   : > { %352 = vmatpush.msra.mxu0 %v335_v23  ;;  %v332_v26 = vld [vmem:[%s894_s16] sm:$0xff]  ;;  %v331_v27 = vld [vmem:[#allocation2] sm:$0xff]  ;;  %v363_v30 = vstv %s508_s26  ;;  %599 = vset.pattern.permute.xlu0 %v761_v34  ;;  %v367_v35 = vld [vmem:[#allocation3] sm:$0xff]  ;;  %vm387_vm9 = vcmask 7168   ;;  %p509_p2 = scmp.ne.s32.totalorder %s746_s20, 2 }
 0x1ed   : > { %v362_v29 = vand.u32 127, %v361_v28 }
 0x1ee   : > { %353 = vmatpush.msra.mxu0 %v334_v24 }
 0x1ef   : > { %v364_v31 = vadd.s32 %v363_v30, %v362_v29 }
 0x1f0   : > { %354 = vmatpush.msra.mxu0 %v333_v25 }
 0x1f1   : > { %vm365_vm8 = vcmp.lt.s32.totalorder %v364_v31, 300  ;;  %v371_v45 = vld [vmem:[#allocation4] sm:$0xff] }
 0x1f2   : > { %355 = vmatpush.msra.mxu0 %v332_v26 }
 0x1f3   : > { %507 = vmatmul.msk.f32.vlgmr.msra.gmra.mxu0 %vm336_vm7, %v331_v27 }
 0x270   : > { %v357_v32 = vpop.f32.mrf.mxu0 }
 0x271   : > { %v366_v33 = vsel %vm365_vm8, %v357_v32, -1e+30 }
 0x272   : > { %368 = vmax.xlane.f32.xlu0 %v366_v33 }
 0x2e5   : > { %v369_v36 = vpop.xlane.xlu0 %368 }
 0x2e6   : > { %v370_v37 = vmax.f32 %v367_v35, %v369_v36 }
 0x2e8   : > { %v372_v38 = vsub.f32 %v367_v35, %v370_v37  ;;  %389 = vst.msk [vmem:[#allocation3] sm:$0xff] %vm387_vm9, %v370_v37  ;;  %378 = vperm.xlu0 %599, %v370_v37  }
 0x2ea   : > { %v373_v43 = vmul.f32 1.442695, %v372_v38 }
 0x35a   : > { %v379_v39 = vpop.permute.xlu0 %378 }
 0x35b   : > { %v381_v40 = vsub.f32 %v366_v33, %v379_v39 }
 0x35d   : > { %v382_v41 = vmul.f32 1.442695, %v381_v40 }
 0x35f   : > { %600 = vpow2.f32 %v382_v41 }
 0x360   : > { %602 = vpow2.f32 %v373_v43 }
 0x365   : > { %v601_v42 = vpop.eup %600 }
 0x366   : > { %384 = vadd.xlane.f32.xlu1 %v601_v42  ;;  %v603_v44 = vpop.eup %602 }
 0x367   : > { %v375_v46 = vmul.f32 %v603_v44, %v371_v45 }
 0x3d8   : > { %393 = sbr.rel (%p509_p2) target bundleno = 1010 (0x3f2), region = 56 }
 0x3d9   : > { %v385_v47 = vpop.xlane.xlu1 %384 }
 0x3da   : > { %v386_v48 = vadd.f32 %v385_v47, %v375_v46 }
 0x3dc   : > { %388 = vst.msk [vmem:[#allocation4] sm:$0xff] %vm387_vm9, %v386_v48 }
 0x3dd   : > { %v394_v51 = vld [vmem:[#allocation3] sm:$0xff]  ;;  %v399_v53 = vld [vmem:[#allocation5] sm:$0xff] }
 0x3e3   : > { %v395_v49 = vld [vmem:[#allocation4] sm:$0xff] }
 0x3e4   : > { %604 = vlog2.f32 %v395_v49 }
 0x3ea   : > { %v605_v50 = vpop.eup %604 }
 0x3eb   : > { %v397_v52 = vmul.f32 0.6931472, %v605_v50 }
 0x3ed   : > { %v398_v54 = vadd.f32 %v397_v52, %v394_v51 }
 0x3ef   : > { %v400_v55 = vsub.f32 %v398_v54, %v399_v53 }
 0x3f1   : > { %401 = vst.msk [vmem:[%s935_s4] sm:$0xff] %vm387_vm9, %v400_v55 }
 0x3f2 PF: > { %s17_s22 = sadd.s32 1, %s754_s22   ;;  %s941_s17 = smov %s738_s18 }
 0x3f3   : > { %p14_p3 = scmp.ge.s32.totalorder %s17_s22, 5   ;;  %s942_s18 = smov %s742_s19 }
 0x3f4   : > { %s943_s19 = smov %s877_s8  ;;  %s944_s20 = smov %s750_s21 }
 0x3f5   : > { %s945_s21 = smov %s947_s14  ;;  %16 = sbr.rel (!%p14_p3) target bundleno = 6 (0x6), region = 92 }
 0x3fa   :  { %421 = vsyncpa [#allocation8], 1 }
 0x3fb   :  { %423 = vsyncpa [#allocation8 + $0x1], 1 }
 0x3fc   :  { %424 = vsyncpa [#allocation10], 1 }

</bundles_post_ra>
